<compile_context>
chip_gen: v7x
topology: tpu7x:2x2x1
jax: 0.10.0
libtpu: 0.0.40
codegen_flags: <defaults>
</compile_context>

<pallas_src>
import functools
import math

import jax
import jax.numpy as jnp
from jax import lax
from jax.experimental import pallas as pl
from jax.experimental.pallas import tpu as pltpu


def _kl_label_smooth_kernel(lp_ref, tgt_ref, loss_ref, *, vocab_size,
                            ignore_col, ignore_value, label_smoothing):
    """One grid step: (tile_n, Vp) log-prob rows -> (tile_n, 1) per-row losses.

    lp_ref:   (tile_n, Vp) log-probabilities (native dtype, cast in the reduce)
    tgt_ref:  (tile_n, 1)  int32 target indices
    loss_ref: (tile_n, 1)  float32 per-row loss contributions
    """
    tgt = tgt_ref[...]                                  # (tn, 1) int32
    vp = lp_ref.shape[-1]

    smooth = label_smoothing / (vocab_size - 2)
    conf = 1.0 - label_smoothing

    # Entropy term of the smoothed target distribution: only two distinct
    # nonzero values exist, so this is a trace-time Python constant
    # (0 * log 0 handled as 0, matching KLDivLoss).
    const_row = 0.0
    if conf > 0.0:
        const_row += conf * math.log(conf)
    if smooth > 0.0:
        const_row += (vocab_size - 2) * smooth * math.log(smooth)

    # (1, Vp) column ids; broadcast against (tn, 1) targets in the compare
    # (no full-tile iota materialized).
    col = lax.broadcasted_iota(jnp.int32, (1, vp), 1)

    # Single fused weighted reduction over the (zero-padded) vocab:
    #   fused = smooth * sum_v lp_v + (conf - smooth) * lp[target]
    # The f32 cast of the block happens only here (single consumer).
    w = jnp.where(col == tgt, jnp.float32(conf), jnp.float32(smooth))
    fused = jnp.sum(lp_ref[...].astype(jnp.float32) * w,
                    axis=-1, keepdims=True)             # (tn, 1)

    # Ignore-column correction read directly from the ref (one lane strip).
    lp_ign = lp_ref[:, ignore_col:ignore_col + 1].astype(jnp.float32)  # (tn,1)

    row_loss = const_row - fused + smooth * lp_ign
    # Rows whose target is the padding value contribute exactly zero.
    row_loss = jnp.where(tgt == ignore_value, 0.0, row_loss)
    loss_ref[...] = row_loss


def custom_loss(log_probs, targets, *, ignore_index, label_smoothing=0.0):
    """Pallas implementation of CustomLoss.forward (sum-reduced KL loss).

    log_probs: (..., V) log-probabilities (any float dtype; kept native in HBM).
    targets:   (...)    integer class indices (same leading dims).
    Returns a scalar float32 loss.
    """
    V = log_probs.shape[-1]
    if V <= 2:
        raise ValueError("vocab_size must be > 2 (label smoothing uses V - 2)")

    # PyTorch's `smooth_dist[:, ignore_index] = 0` wraps negative indices;
    # the padding-row comparison (`targets == ignore_index`) uses the raw value.
    ignore_col = ignore_index + V if ignore_index < 0 else ignore_index
    if not 0 <= ignore_col < V:
        raise ValueError(
            f"ignore_index={ignore_index} is out of range for vocab_size={V}")

    lp = log_probs.reshape(-1, V)            # native dtype; cast done in-kernel
    tgt = targets.reshape(-1, 1).astype(jnp.int32)
    N = lp.shape[0]

    # Lane-dense vocab: pad to a multiple of 128 with zeros. Zero columns add
    # nothing to the weighted row-sum and can never be the target / ignore col.
    Vp = ((V + 127) // 128) * 128
    if Vp != V:
        lp = jnp.pad(lp, ((0, 0), (0, Vp - V)))

    itemsize = jnp.dtype(lp.dtype).itemsize
    # Packed-sublane native tile height: 8 rows (f32), 16 (bf16), 32 (1-byte).
    row_align = max(8, 32 // itemsize)

    # VMEM-aware row tile: the double-buffered input block plus worst-case f32
    # elementwise temporaries (mask / weights / product, ~13 B/elem) must stay
    # comfortably inside the 32 MiB scoped limit.
    vmem_budget = 24 * 1024 * 1024
    bytes_per_row = Vp * (2 * itemsize + 13)
    max_tile = max(row_align,
                   (vmem_budget // bytes_per_row) // row_align * row_align)

    N_ceil = ((N + row_align - 1) // row_align) * row_align
    # Keep >= ~4 blocks when the row count allows it so the single "parallel"
    # grid axis can shard across both v7x TensorCores and overlap DMA/compute.
    cap_parallel = -(-N_ceil // 4)
    cap_parallel = max(row_align,
                       ((cap_parallel + row_align - 1) // row_align) * row_align)

    tile_n = min(max_tile, 1024, cap_parallel, N_ceil)

    grid_n = -(-N // tile_n)
    N_pad = grid_n * tile_n
    if N_pad != N:
        lp = jnp.pad(lp, ((0, N_pad - N), (0, 0)))
        # Padded rows get target == ignore_index -> exactly zero contribution.
        tgt = jnp.pad(tgt, ((0, N_pad - N), (0, 0)),
                      constant_values=ignore_index)

    kernel = functools.partial(
        _kl_label_smooth_kernel,
        vocab_size=V,
        ignore_col=ignore_col,
        ignore_value=ignore_index,
        label_smoothing=float(label_smoothing),
    )

    # TODO(synk): add a second ("arbitrary") grid axis tiling Vp (with a
    #             per-row accumulator) for vocabularies large enough that even
    #             row_align rows exceed the VMEM budget.
    row_losses = pl.pallas_call(
        kernel,
        out_shape=jax.ShapeDtypeStruct((N_pad, 1), jnp.float32),
        grid=(grid_n,),
        in_specs=[
            pl.BlockSpec((tile_n, Vp), lambda i: (i, 0)),
            pl.BlockSpec((tile_n, 1), lambda i: (i, 0)),
        ],
        out_specs=pl.BlockSpec((tile_n, 1), lambda i: (i, 0)),
        compiler_params=pltpu.CompilerParams(
            dimension_semantics=("parallel",),
            vmem_limit_bytes=32 * 1024 * 1024),
    )(lp, tgt)

    # Final scalar reduction over independent per-row partials (tiny XLA sum).
    return jnp.sum(row_losses)


def _reference_loss(log_probs, targets, *, ignore_index, label_smoothing):
    """Plain-JAX reference mirroring the PyTorch module, for verification."""
    V = log_probs.shape[-1]
    ign_col = ignore_index + V if ignore_index < 0 else ignore_index
    lp = log_probs.reshape(-1, V).astype(jnp.float32)
    tgt = targets.reshape(-1).astype(jnp.int32)
    N = lp.shape[0]
    col = jnp.arange(V)[None, :]
    t = jnp.full((N, V), label_smoothing / (V - 2), jnp.float32)
    t = jnp.where(col == tgt[:, None], 1.0 - label_smoothing, t)
    t = jnp.where(col == ign_col, 0.0, t)
    t = jnp.where(tgt[:, None] == ignore_index, 0.0, t)
    t_safe = jnp.where(t > 0, t, 1.0)
    return jnp.sum(jnp.where(t > 0, t * (jnp.log(t_safe) - lp), 0.0))


if __name__ == "__main__":
    ignore_index = 1
    label_smoothing = 0.1
    key = jax.random.PRNGKey(0)

    # Test 1: batch=2, seq=8, vocab=32 (f32).
    batch, seq, vocab = 2, 8, 32
    k_lp, k_tgt, key = jax.random.split(key, 3)
    logits = jax.random.normal(k_lp, (batch, seq, vocab), dtype=jnp.float32)
    log_probs = jax.nn.log_softmax(logits, axis=-1)
    targets = jax.random.randint(k_tgt, (batch, seq), 0, vocab, dtype=jnp.int32)
    targets = targets.at[0, -2:].set(ignore_index)
    targets = targets.at[1, -1].set(ignore_index)

    loss = custom_loss(log_probs, targets,
                       ignore_index=ignore_index,
                       label_smoothing=label_smoothing)
    loss = jax.block_until_ready(loss)
    ref = _reference_loss(log_probs, targets,
                          ignore_index=ignore_index,
                          label_smoothing=label_smoothing)
    assert jnp.allclose(loss, ref, rtol=1e-5, atol=1e-5), (loss, ref)

    # Test 2: non-multiple-of-16 row count (exercises N padding) + bf16 input.
    batch2, seq2 = 3, 5
    k_lp2, k_tgt2, key = jax.random.split(key, 3)
    logits2 = jax.random.normal(k_lp2, (batch2, seq2, vocab), dtype=jnp.float32)
    log_probs2 = jax.nn.log_softmax(logits2, axis=-1).astype(jnp.bfloat16)
    targets2 = jax.random.randint(k_tgt2, (batch2, seq2), 0, vocab,
                                  dtype=jnp.int32)
    targets2 = targets2.at[2, -1].set(ignore_index)

    loss2 = custom_loss(log_probs2, targets2,
                        ignore_index=ignore_index,
                        label_smoothing=label_smoothing)
    loss2 = jax.block_until_ready(loss2)
    ref2 = _reference_loss(log_probs2, targets2,
                           ignore_index=ignore_index,
                           label_smoothing=label_smoothing)
    assert jnp.allclose(loss2, ref2, rtol=1e-5, atol=1e-4), (loss2, ref2)

    # Test 3: negative ignore_index (PyTorch-style wrapping of the zeroed
    # column). Targets drawn from [0, vocab-1) so none hits the wrapped column.
    k_lp3, k_tgt3, key = jax.random.split(key, 3)
    logits3 = jax.random.normal(k_lp3, (2, 8, vocab), dtype=jnp.float32)
    log_probs3 = jax.nn.log_softmax(logits3, axis=-1)
    targets3 = jax.random.randint(k_tgt3, (2, 8), 0, vocab - 1, dtype=jnp.int32)

    loss3 = custom_loss(log_probs3, targets3,
                        ignore_index=-1,
                        label_smoothing=label_smoothing)
    loss3 = jax.block_until_ready(loss3)
    ref3 = _reference_loss(log_probs3, targets3,
                           ignore_index=-1,
                           label_smoothing=label_smoothing)
    assert jnp.allclose(loss3, ref3, rtol=1e-5, atol=1e-5), (loss3, ref3)

    print("KERNEL_OK")
</pallas_src>

<mosaic_0001>
module attributes {stable_mosaic.version = 11 : i64} {
  func.func @_kl_label_smooth_kernel(%arg0: i32, %arg1: memref<8x128xf32, #tpu.memory_space<vmem>>, %arg2: memref<8x1xi32, #tpu.memory_space<vmem>>, %arg3: memref<8x1xf32, #tpu.memory_space<vmem>>) attributes {dimension_semantics = [#tpu.dimension_semantics<parallel>], iteration_bounds = array<i64: 2>, scalar_prefetch = 0 : i64, scratch_operands = 0 : i64, tpu.core_type = #tpu.core_type<tc>, window_params = [{transform_indices = @transform_0, window_bounds = array<i64: 8, 128>}, {transform_indices = @transform_1, window_bounds = array<i64: 8, 1>}, {transform_indices = @transform_2, window_bounds = array<i64: 8, 1>}]} {
    %c0 = arith.constant 0 : index
    %c0_0 = arith.constant 0 : index
    %0 = vector.load %arg2[%c0, %c0_0] : memref<8x1xi32, #tpu.memory_space<vmem>>, vector<8x1xi32>
    %1 = tpu.iota {dimensions = array<i32: 1>} : vector<1x128xi32>
    %2 = vector.broadcast %1 : vector<1x128xi32> to vector<8x128xi32>
    %3 = vector.broadcast %0 : vector<8x1xi32> to vector<8x128xi32>
    %4 = arith.cmpi eq, %2, %3 : vector<8x128xi32>
    %cst = arith.constant 0.899999976 : f32
    %cst_1 = arith.constant 0.00333333341 : f32
    %5 = vector.broadcast %cst : f32 to vector<8x128xf32>
    %6 = vector.broadcast %cst_1 : f32 to vector<8x128xf32>
    %7 = arith.select %4, %5, %6 : vector<8x128xi1>, vector<8x128xf32>
    %c0_2 = arith.constant 0 : index
    %c0_3 = arith.constant 0 : index
    %8 = vector.load %arg1[%c0_2, %c0_3] : memref<8x128xf32, #tpu.memory_space<vmem>>, vector<8x128xf32>
    %9 = arith.mulf %8, %7 : vector<8x128xf32>
    %cst_4 = arith.constant dense<0.000000e+00> : vector<8xf32>
    %10 = vector.multi_reduction <add>, %9, %cst_4 [1] : vector<8x128xf32> to vector<8xf32>
    %11 = vector.shape_cast %10 : vector<8xf32> to vector<8x1xf32>
    %c0_5 = arith.constant 0 : index
    %c1 = arith.constant 1 : index
    %12 = vector.load %arg1[%c0_5, %c1] : memref<8x128xf32, #tpu.memory_space<vmem>>, vector<8x1xf32>
    %cst_6 = arith.constant -0.665202737 : f32
    %13 = vector.broadcast %cst_6 : f32 to vector<8x1xf32>
    %14 = arith.subf %13, %11 : vector<8x1xf32>
    %cst_7 = arith.constant 0.00333333341 : f32
    %15 = vector.broadcast %cst_7 : f32 to vector<8x1xf32>
    %16 = arith.mulf %15, %12 : vector<8x1xf32>
    %17 = arith.addf %14, %16 : vector<8x1xf32>
    %c1_i32 = arith.constant 1 : i32
    %18 = vector.broadcast %c1_i32 : i32 to vector<8x1xi32>
    %19 = arith.cmpi eq, %0, %18 : vector<8x1xi32>
    %cst_8 = arith.constant 0.000000e+00 : f32
    %20 = vector.broadcast %cst_8 : f32 to vector<8x1xf32>
    %21 = arith.select %19, %20, %17 : vector<8x1xi1>, vector<8x1xf32>
    %c0_9 = arith.constant 0 : index
    %c0_10 = arith.constant 0 : index
    %22 = vector.load %arg3[%c0_9, %c0_10] : memref<8x1xf32, #tpu.memory_space<vmem>>, vector<8x1xf32>
    tpu.vector_store %arg3[%c0_9, %c0_10], %21 {strides = array<i32>} : memref<8x1xf32, #tpu.memory_space<vmem>>, vector<8x1xf32>,
    return
  }
  func.func @transform_0(%arg0: i32) -> (i32, i32) {
    %c0_i32 = arith.constant 0 : i32
    %c0_i32_0 = arith.constant 0 : i32
    return %arg0, %c0_i32 : i32, i32
  }
  func.func @transform_1(%arg0: i32) -> (i32, i32) {
    %c0_i32 = arith.constant 0 : i32
    %c0_i32_0 = arith.constant 0 : i32
    return %arg0, %c0_i32 : i32, i32
  }
  func.func @transform_2(%arg0: i32) -> (i32, i32) {
    %c0_i32 = arith.constant 0 : i32
    %c0_i32_0 = arith.constant 0 : i32
    return %arg0, %c0_i32 : i32, i32
  }
}

</mosaic_0001>

<bundles_post_ra>
// kernel: tpu_custom_call.1
= control target key start
LH: loop header
LB: loop body
LE: loop exit
PB: predicated region body
PF: predicated region fallthrough
CT: control target
= control target key end

     0   :  { %s292_s9 = smov 0   ;;  %s312_s0 = inlined_call_operand.vmem [shape: f32[16,128], index: 0, kind: input, shape index: {}]   ;;  %s313_s1 = inlined_call_operand.vmem [shape: s32[16,1], index: 1, kind: input, shape index: {}]   ;;  %s314_s2 = inlined_call_operand.vmem [shape: f32[16,1], index: 2, kind: output, shape index: {}]  }
   0x1 LB: > { %s244_s10 = sadd.s32 4294967295, %s272_s9   ;;  %p248_p0 = scmp.ge.s32.totalorder %s272_s9, 1  ;;  %s272_s9 = sphi %s292_s9, %s12_s9  }
   0x2   : > { %p120_p1 = scmp.lt.s32.totalorder %s272_s9, 3 }
   0x4   : > { %p121_p2 = pnand %p248_p0, %p120_p1 }
   0x5   : > { %p144_p3 = scmp.lt.s32.totalorder (!%p121_p2), %s244_s10, 1  ;;  %v274_v0 = vmov (!%p121_p2), 0   ;;  %v157_v2 = vlaneseq (!%p121_p2)  ;;  %v275_v6 = vmov (!%p121_p2), 0.0033333334   ;;  %s276_s18 = smov (!%p121_p2), 127   ;;  %vm177_vm2 = vcmask (!%p121_p2), 7168  }
   0x6   : > { %124 = sbr.rel (%p121_p2) target bundleno = 412 (0x19c), region = 28  ;;  %265 = vset.pattern.permute.xlu0 (!%p121_p2), %v274_v0 }
   0x7   : > { %v158_v3 = vand.u32 (!%p121_p2), 127, %v157_v2 }
   0xd   : > { %s316_s10 = smov (!%p144_p3, %s244_s10), 1 }
   0xe   : > { %s249_s11 = sshll.u32 %s316_s10, 3 }
   0xf   : > { %s151_s14 = scalar_lea.vmem %s313_s1, %s249_s11  ;;  %s147_s17 = scalar_lea.vmem %s312_s0, %s249_s11 }
  0x10   : > { %v156_v1 = vld [vmem:[%s151_s14] sm:$0xff]  ;;  %s155_s21 = scalar_lea.vmem %s314_s2, %s249_s11 }
  0x11   : > { %160 = vperm.xlu0 %265, %v156_v1   ;;  %v164_v5 = vld [vmem:[%s147_s17] sm:$0xff]  ;;  %vm171_vm1 = vcmp.eq.s32.totalorder %v156_v1, 1 }
  0x12   : > { %v169_v9 = vmul.f32 0.0033333334, %v164_v5 }
  0x90   : > { %v161_v4 = vpop.permute.xlu0 %160 }
  0x91   : > { %vm162_vm0 = vcmp.eq.s32.totalorder %v158_v3, %v161_v4 }
  0x92   : > { %v163_v7 = vsel %vm162_vm0, 0.9, %v275_v6 }
  0x93   : > { %v165_v8 = vmul.f32 %v164_v5, %v163_v7 }
  0x95   : > { %166 = vadd.xlane.f32.xlu0 %v165_v8 }
 0x122   : > { %v167_v10 = vpop.xlane.xlu0 %166 }
 0x123   : > { %v168_v11 = vsub.f32 -0.66520274, %v167_v10 }
 0x125   : > { %v170_v12 = vadd.f32 %v169_v9, %v168_v11 }
 0x127   : > { %173 = vrot.lane.b32.xlu1 %v170_v12, %s276_s18 }
 0x199   : > { %v174_v13 = vpop.permute.xlu1 %173 }
 0x19a   : > { %v176_v14 = vsel %vm171_vm1, 0.0, %v174_v13 }
 0x19b   : > { %178 = vst.msk [vmem:[%s155_s21] sm:$0xff] %vm177_vm2, %v176_v14 }
 0x19c PF: > { %s12_s9 = sadd.s32 1, %s272_s9  }
 0x19d   : > { %p9_p4 = scmp.ge.s32.totalorder %s12_s9, 4  }
 0x19f   :  { %11 = sbr.rel (!%p9_p4) target bundleno = 1 (0x1), region = 61 }

</bundles_post_ra>
